<compile_context>
chip_gen: v5e
topology: v5e:2x2
jax: 0.10.0
libtpu: 0.0.40
codegen_flags: <defaults>
</compile_context>

<pallas_src>
import functools

import jax
import jax.numpy as jnp
import numpy as np
from jax.experimental import pallas as pl
from jax.experimental.pallas import tpu as pltpu

_LANE = 128


def _make_gcn_kernel(add_residual: bool):
    def kernel(adj_ref, feat_ref, w_ref, sl_ref, bias_ref, out_ref):
        adj = adj_ref[0]            # (N, N)       f32
        feat = feat_ref[0]          # (N, Fin_p)   f32 (zero-padded lanes)
        w = w_ref[...]              # (Fin_p, Fout_p)
        bias = bias_ref[...]        # (1, Fout_p)
        self_loop = sl_ref[0]       # scalar (SMEM)

        # Degrees, clamped to >= 1 (f32 accumulation, exact for 0/1 adjacency).
        src_deg = jnp.maximum(jnp.sum(adj, axis=0, keepdims=True), 1.0)   # (1, N)
        dst_deg = jnp.maximum(jnp.sum(adj, axis=1, keepdims=True), 1.0)   # (N, 1)
        norm_src = jax.lax.rsqrt(src_deg)   # (1, N) row — stays lane-aligned, no relayout
        norm_dst = jax.lax.rsqrt(dst_deg)   # (N, 1)

        # loop = feat @ W   (also reused for the aggregation term below)
        loop = jnp.dot(feat, w, preferred_element_type=jnp.float32)       # (N, Fout_p)

        # adj @ diag(norm_src) @ feat @ W  ==  (adj * norm_src_row) @ loop
        # This is identical to both PyTorch matmul orderings, so no Fin/Fout branch and
        # one fewer MXU matmul.
        adj_n = adj * norm_src                                            # sublane bcast
        rst = jnp.dot(adj_n, loop, preferred_element_type=jnp.float32)    # (N, Fout_p)

        rst = rst * norm_dst + self_loop * loop + bias
        if add_residual:            # static branch: in_feats == out_feats
            rst = rst + feat        # padded columns of feat are zero -> exact
        out_ref[0] = rst

    return kernel


def _round_up(x, m):
    return ((x + m - 1) // m) * m


@jax.jit
def gcn_with_loop(adj, feat, weight, self_loop, bias):
    """Batched GCNWithLoop forward. adj: (B,N,N), feat: (B,N,Fin)."""
    B, N, _ = adj.shape
    in_feats, out_feats = weight.shape
    fin_p = _round_up(in_feats, _LANE)
    fout_p = _round_up(out_feats, _LANE)

    adj = adj.astype(jnp.float32)
    feat_p = jnp.zeros((B, N, fin_p), jnp.float32).at[:, :, :in_feats].set(feat)
    w_p = jnp.zeros((fin_p, fout_p), jnp.float32).at[:in_feats, :out_feats].set(weight)
    bias_p = jnp.zeros((1, fout_p), jnp.float32).at[0, :out_feats].set(bias)
    sl = self_loop.reshape(1).astype(jnp.float32)

    kernel = _make_gcn_kernel(add_residual=(in_feats == out_feats))

    out_p = pl.pallas_call(
        kernel,
        out_shape=jax.ShapeDtypeStruct((B, N, fout_p), jnp.float32),
        grid=(B,),
        in_specs=[
            pl.BlockSpec((1, N, N), lambda b: (b, 0, 0)),        # adj  (per-graph)
            pl.BlockSpec((1, N, fin_p), lambda b: (b, 0, 0)),    # feat (per-graph)
            pl.BlockSpec((fin_p, fout_p), lambda b: (0, 0)),     # weight (resident)
            pl.BlockSpec(memory_space=pltpu.MemorySpace.SMEM),   # self_loop scalar
            pl.BlockSpec((1, fout_p), lambda b: (0, 0)),         # bias (resident)
        ],
        out_specs=pl.BlockSpec((1, N, fout_p), lambda b: (b, 0, 0)),
        compiler_params=pltpu.CompilerParams(
            dimension_semantics=("parallel",)),
    )(adj, feat_p, w_p, sl, bias_p)

    return out_p[:, :, :out_feats]


def gcn_reference(adj, feat, weight, self_loop, bias):
    """Pure-JAX reference mirroring the PyTorch forward (norm='both', bias, act=None)."""
    in_feats, out_feats = weight.shape
    src_deg = jnp.maximum(adj.sum(axis=-2), 1.0)          # adj.sum(dim=0) per graph
    dst_deg = jnp.maximum(adj.sum(axis=-1), 1.0)          # adj.sum(dim=1) per graph
    loop = feat @ weight
    feat_src = feat * (src_deg ** -0.5)[..., None]
    if in_feats > out_feats:
        rst = adj @ (feat_src @ weight)
    else:
        rst = (adj @ feat_src) @ weight
    rst = rst * (dst_deg ** -0.5)[..., None]
    rst = rst + self_loop[0] * loop
    rst = rst + bias
    if in_feats == out_feats:
        rst = rst + feat
    return rst


def _run_case(B, N, in_feats, out_feats, key):
    k_adj, k_feat, k_w, k_b = jax.random.split(key, 4)
    adj = (jax.random.uniform(k_adj, (B, N, N)) < 0.3).astype(jnp.float32)
    feat = jax.random.normal(k_feat, (B, N, in_feats), dtype=jnp.float32)
    bound = float(np.sqrt(6.0 / (in_feats + out_feats)))  # xavier_uniform
    weight = jax.random.uniform(
        k_w, (in_feats, out_feats), minval=-bound, maxval=bound, dtype=jnp.float32)
    # Non-default parameter values so the self_loop / bias terms are actually exercised.
    self_loop = jnp.full((1,), 0.5, dtype=jnp.float32)
    bias = 0.1 * jax.random.normal(k_b, (out_feats,), dtype=jnp.float32)

    out = jax.block_until_ready(gcn_with_loop(adj, feat, weight, self_loop, bias))
    ref = gcn_reference(adj, feat, weight, self_loop, bias)
    np.testing.assert_allclose(np.asarray(out), np.asarray(ref), rtol=1e-4, atol=1e-5)


if __name__ == "__main__":
    B, N = 8, 16
    key = jax.random.PRNGKey(0)
    k1, k2 = jax.random.split(key)

    _run_case(B, N, 32, 32, k1)   # in == out -> residual branch
    _run_case(B, N, 48, 32, k2)   # in > out  -> other PyTorch matmul-order branch

    print("KERNEL_OK")
</pallas_src>

<mosaic_0001>
module attributes {stable_mosaic.version = 11 : i64} {
  func.func @kernel(%arg0: i32, %arg1: memref<1x16x16xf32, #tpu.memory_space<vmem>>, %arg2: memref<1x16x128xf32, #tpu.memory_space<vmem>>, %arg3: memref<128x128xf32, #tpu.memory_space<vmem>>, %arg4: memref<1xf32, #tpu.memory_space<smem>>, %arg5: memref<1x128xf32, #tpu.memory_space<vmem>>, %arg6: memref<1x16x128xf32, #tpu.memory_space<vmem>>) attributes {dimension_semantics = [#tpu.dimension_semantics<parallel>], iteration_bounds = array<i64: 8>, scalar_prefetch = 0 : i64, scratch_operands = 0 : i64, tpu.core_type = #tpu.core_type<tc>, window_params = [{transform_indices = @transform_0, window_bounds = array<i64: 1, 16, 16>}, {transform_indices = @transform_1, window_bounds = array<i64: 1, 16, 128>}, {pipeline_mode = #tpu.pipeline_mode<synchronous>, transform_indices = @transform_2, window_bounds = array<i64: 128, 128>}, {transform_indices = @transform_3, window_bounds = array<i64: 1>}, {pipeline_mode = #tpu.pipeline_mode<synchronous>, transform_indices = @transform_4, window_bounds = array<i64: 1, 128>}, {transform_indices = @transform_5, window_bounds = array<i64: 1, 16, 128>}]} {
    %c0 = arith.constant 0 : index
    %c0_0 = arith.constant 0 : index
    %c0_1 = arith.constant 0 : index
    %0 = vector.load %arg1[%c0, %c0_0, %c0_1] : memref<1x16x16xf32, #tpu.memory_space<vmem>>, vector<1x16x16xf32>
    %1 = vector.shape_cast %0 : vector<1x16x16xf32> to vector<16x16xf32>
    %c0_2 = arith.constant 0 : index
    %c0_3 = arith.constant 0 : index
    %c0_4 = arith.constant 0 : index
    %2 = vector.load %arg2[%c0_2, %c0_3, %c0_4] : memref<1x16x128xf32, #tpu.memory_space<vmem>>, vector<1x16x128xf32>
    %3 = vector.shape_cast %2 : vector<1x16x128xf32> to vector<16x128xf32>
    %c0_5 = arith.constant 0 : index
    %c0_6 = arith.constant 0 : index
    %4 = vector.load %arg3[%c0_5, %c0_6] : memref<128x128xf32, #tpu.memory_space<vmem>>, vector<128x128xf32>
    %c0_7 = arith.constant 0 : index
    %c0_8 = arith.constant 0 : index
    %5 = vector.load %arg5[%c0_7, %c0_8] : memref<1x128xf32, #tpu.memory_space<vmem>>, vector<1x128xf32>
    %c0_9 = arith.constant 0 : index
    %6 = memref.load %arg4[%c0_9] : memref<1xf32, #tpu.memory_space<smem>>
    %cst = arith.constant dense<0.000000e+00> : vector<16xf32>
    %7 = vector.multi_reduction <add>, %1, %cst [0] : vector<16x16xf32> to vector<16xf32>
    %8 = vector.shape_cast %7 : vector<16xf32> to vector<1x16xf32>
    %cst_10 = arith.constant 1.000000e+00 : f32
    %9 = vector.broadcast %cst_10 : f32 to vector<1x16xf32>
    %10 = arith.maximumf %8, %9 : vector<1x16xf32>
    %cst_11 = arith.constant dense<0.000000e+00> : vector<16xf32>
    %11 = vector.multi_reduction <add>, %1, %cst_11 [1] : vector<16x16xf32> to vector<16xf32>
    %12 = vector.shape_cast %11 : vector<16xf32> to vector<16x1xf32>
    %cst_12 = arith.constant 1.000000e+00 : f32
    %13 = vector.broadcast %cst_12 : f32 to vector<16x1xf32>
    %14 = arith.maximumf %12, %13 : vector<16x1xf32>
    %15 = math.rsqrt %10 : vector<1x16xf32>
    %16 = math.rsqrt %14 : vector<16x1xf32>
    %cst_13 = arith.constant dense<0.000000e+00> : vector<16x128xf32>
    %17 = tpu.matmul %3, %4, %cst_13 {dimension_numbers = #tpu.dot_dimension_numbers<[1], [0], [0], [1], [0, 0, 1, 1], [], []>} : vector<16x128xf32>, vector<128x128xf32>, vector<16x128xf32> -> vector<16x128xf32>
    %18 = vector.broadcast %15 : vector<1x16xf32> to vector<16x16xf32>
    %19 = arith.mulf %1, %18 : vector<16x16xf32>
    %cst_14 = arith.constant dense<0.000000e+00> : vector<16x128xf32>
    %20 = tpu.matmul %19, %17, %cst_14 {dimension_numbers = #tpu.dot_dimension_numbers<[1], [0], [0], [1], [0, 0, 1, 1], [], []>} : vector<16x16xf32>, vector<16x128xf32>, vector<16x128xf32> -> vector<16x128xf32>
    %21 = vector.broadcast %16 : vector<16x1xf32> to vector<16x128xf32>
    %22 = arith.mulf %20, %21 : vector<16x128xf32>
    %23 = vector.broadcast %6 : f32 to vector<16x128xf32>
    %24 = arith.mulf %23, %17 : vector<16x128xf32>
    %25 = arith.addf %22, %24 : vector<16x128xf32>
    %26 = vector.broadcast %5 : vector<1x128xf32> to vector<16x128xf32>
    %27 = arith.addf %25, %26 : vector<16x128xf32>
    %28 = arith.addf %27, %3 : vector<16x128xf32>
    %c0_15 = arith.constant 0 : index
    %c0_16 = arith.constant 0 : index
    %c0_17 = arith.constant 0 : index
    %29 = vector.load %arg6[%c0_15, %c0_16, %c0_17] : memref<1x16x128xf32, #tpu.memory_space<vmem>>, vector<1x16x128xf32>
    %30 = vector.shape_cast %29 : vector<1x16x128xf32> to vector<16x128xf32>
    %31 = vector.shape_cast %28 : vector<16x128xf32> to vector<1x16x128xf32>
    tpu.vector_store %arg6[%c0_15, %c0_16, %c0_17], %31 {strides = array<i32>} : memref<1x16x128xf32, #tpu.memory_space<vmem>>, vector<1x16x128xf32>,
    return
  }
  func.func @transform_0(%arg0: i32) -> (i32, i32, i32) {
    %c0_i32 = arith.constant 0 : i32
    %c0_i32_0 = arith.constant 0 : i32
    %c0_i32_1 = arith.constant 0 : i32
    return %arg0, %c0_i32, %c0_i32_0 : i32, i32, i32
  }
  func.func @transform_1(%arg0: i32) -> (i32, i32, i32) {
    %c0_i32 = arith.constant 0 : i32
    %c0_i32_0 = arith.constant 0 : i32
    %c0_i32_1 = arith.constant 0 : i32
    return %arg0, %c0_i32, %c0_i32_0 : i32, i32, i32
  }
  func.func @transform_2(%arg0: i32) -> (i32, i32) {
    %c0_i32 = arith.constant 0 : i32
    %c0_i32_0 = arith.constant 0 : i32
    %c0_i32_1 = arith.constant 0 : i32
    return %c0_i32, %c0_i32_0 : i32, i32
  }
  func.func @transform_3(%arg0: i32) -> i32 {
    %c0_i32 = arith.constant 0 : i32
    %c0_i32_0 = arith.constant 0 : i32
    return %c0_i32 : i32
  }
  func.func @transform_4(%arg0: i32) -> (i32, i32) {
    %c0_i32 = arith.constant 0 : i32
    %c0_i32_0 = arith.constant 0 : i32
    %c0_i32_1 = arith.constant 0 : i32
    return %c0_i32, %c0_i32_0 : i32, i32
  }
  func.func @transform_5(%arg0: i32) -> (i32, i32, i32) {
    %c0_i32 = arith.constant 0 : i32
    %c0_i32_0 = arith.constant 0 : i32
    %c0_i32_1 = arith.constant 0 : i32
    return %arg0, %c0_i32, %c0_i32_0 : i32, i32, i32
  }
}

</mosaic_0001>

<bundles_post_ra>
// kernel: gcn_with_loop.1
= control target key start
LH: loop header
LB: loop body
LE: loop exit
PB: predicated region body
PF: predicated region fallthrough
CT: control target
= control target key end

     0   :  { %s821_s0 = inlined_call_operand.vmem [shape: f32[8,16,16], index: 0, kind: input, shape index: {}]   ;;  %s822_s1 = inlined_call_operand.vmem [shape: f32[8,16,128], index: 1, kind: input, shape index: {}]   ;;  %s823_s2 = inlined_call_operand.vmem [shape: f32[128,128], index: 2, kind: input, shape index: {}]   ;;  %s824_s3 = inlined_call_operand.<no memory space> [shape: f32[1], index: 3, kind: input, shape index: {}]   ;;  %s825_s4 = inlined_call_operand.vmem [shape: f32[1,128], index: 4, kind: input, shape index: {}]   ;;  %s826_s5 = inlined_call_operand.hbm [shape: f32[8,16,128], index: 5, kind: output, shape index: {}]  }
   0x1   :  { %10 = sst [smem:[#allocation2]] %s824_s3 }
   0x2   :  { %11 = vsyncpa [#allocation4], 0 }
   0x3   :  { %13 = vsyncpa [#allocation4 + $0x1], 0  ;;  %s655_s20 = smov 0   ;;  %s657_s21 = smov 0  }
   0x4   :  { %s659_s22 = smov 0   ;;  %s661_s23 = smov 0  }
   0x5 LB: > { %s676_s3 = sadd.s32 4294967295, %s618_s23   ;;  %s473_s24 = sadd.s32 4294967294, %s618_s23   ;;  %s618_s23 = sphi %s661_s23, %s832_s23   ;;  %s614_s22 = sphi %s659_s22, %s831_s22   ;;  %s610_s21 = sphi %s657_s21, %s830_s21   ;;  %s606_s20 = sphi %s655_s20, %s829_s20  }
   0x6   : > { %s680_s25 = sadd.s32 1, %s618_s23   ;;  %s141_s26 = sadd.s32 1, %s614_s22 }
   0x7   : > { %s138_s27 = ssub.s32 %s618_s23, %s680_s25  ;;  %p151_p0 = scmp.ne.s32.totalorder %s614_s22, %s610_s21 }
   0x8   : > { %p139_p1 = scmp.eq.s32.totalorder %s138_s27, 0  ;;  %p152_p2 = scmp.eq.s32.totalorder %s676_s3, 7 }
   0x9   : > { %p157_p3 = scmp.ne.s32.totalorder %s610_s21, %s606_s20  ;;  %p158_p4 = scmp.eq.s32.totalorder %s473_s24, 7 }
   0xa   : > { %s691_s28 = scalar_select %p139_p1, %s614_s22, %s141_s26  }
   0xb   : > { %p693_p5 = por %p152_p2, %p151_p0  ;;  %p697_p6 = por %p158_p4, %p157_p3 }
   0xc   : > { %p476_p7 = scmp.ge.s32.totalorder %s618_s23, 1  ;;  %p201_p8 = scmp.lt.s32.totalorder %s618_s23, 9 }
   0xe   : > { %p202_p9 = pnand %p476_p7, %p201_p8 }
   0xf   : > { %p234_p10 = scmp.lt.s32.totalorder (!%p202_p9), %s676_s3, 7  ;;  %s491_s19 = sshll.u32 (!%p202_p9), %s676_s3, 4 }
  0x10   : > { %205 = sbr.rel (%p202_p9) target bundleno = 334 (0x14e), region = 40  ;;  %s395_s27 = scalar_lea.hbm (!%p202_p9), %s826_s5, %s491_s19 }
  0x11   : > { %s398_s8 = sshll.u32 (!%p202_p9), %s395_s27, 4  ;;  %s576_s14 = scalar_lea.hbm (!%p202_p9), %s826_s5, 128  ;;  %s399_s8 = int_to_ptr.hbm [resolvable:$true] %s398_s8 }
  0x12   : > { %s570_s9 = sshra.s32 (!%p202_p9), %s399_s8, 4  ;;  %s571_s9 = int_to_ptr.hbm [resolvable:$true] %s570_s9 }
  0x13   : > { %s572_s10 = scalar_lea.hbm (!%p202_p9), %s571_s9, 16  ;;  %p577_p0 = scmp.lt.s32.totalorder (!%p202_p9), %s571_s9, %s826_s5 }
  0x14   : > { %p573_p11 = scmp.ne.s32.totalorder (!%p202_p9), %s571_s9, %s572_s10  ;;  %p578_p1 = scmp.lt.s32.totalorder (!%p202_p9), %s576_s14, %s572_s10 }
  0x15   : > { %v263_v0 = vld [vmem:[%s823_s2 + $0x78] sm:$0xff]  ;;  %v262_v1 = vld [vmem:[%s823_s2 + $0x70] sm:$0xff]  ;;  %v261_v2 = vld [vmem:[%s823_s2 + $0x68] sm:$0xff]  ;;  %s714_s12 = scalar_select %p234_p10, %s676_s3, 7  ;;  %vm266_vm0 = vcmask 130048  }
  0x16   : > { %492 = vmatpush.msra.mxu2 %v263_v0  ;;  %313 = vmatpush.msra.mxu0 %v263_v0  ;;  %v260_v3 = vld [vmem:[%s823_s2 + $0x60] sm:$0xff]  ;;  %v259_v4 = vld [vmem:[%s823_s2 + $0x58] sm:$0xff]  ;;  %v258_v8 = vld [vmem:[%s823_s2 + $0x50] sm:$0xff]  ;;  %p574_p12 = pnand %p573_p11, %p693_p5  ;;  %p579_p2 = por %p578_p1, %p577_p0 }
  0x17   : > { %s489_s15 = sshll.u32 %s714_s12, 4  ;;  %v257_v11 = vld [vmem:[%s823_s2 + $0x48] sm:$0xff]  ;;  %v256_v13 = vld [vmem:[%s823_s2 + $0x40] sm:$0xff]  ;;  %v255_v15 = vld [vmem:[%s823_s2 + $0x38] sm:$0xff]  ;;  %s265_s12 = sld [smem:[#allocation2]] }
  0x18   : > { %493 = vmatpush.msra.mxu2 %v262_v1  ;;  %314 = vmatpush.msra.mxu0 %v262_v1  ;;  %s238_s18 = scalar_lea.vmem %s821_s0, %s489_s15  ;;  %v254_v17 = vld [vmem:[%s823_s2 + $0x30] sm:$0xff]  ;;  %v253_v19 = vld [vmem:[%s823_s2 + $0x28] sm:$0xff]  ;;  %v252_v21 = vld [vmem:[%s823_s2 + $0x20] sm:$0xff]  ;;  %s243_s11 = scalar_lea.vmem %s822_s1, %s489_s15 }
  0x19   : > { %v728_v5 = vld [vmem:[%s238_s18] sm:$0xff]  ;;  %v732_v7 = vld [vmem:[%s238_s18 + $0x8] sm:$0xff]  ;;  %v251_v23 = vld [vmem:[%s823_s2 + $0x18] sm:$0xff]  ;;  %s231_s15 = sand.u32 1, %s610_s21   ;;  %p575_p13 = pneg %p574_p12 }
  0x1a   : > { %494 = vmatpush.msra.mxu2 %v261_v2  ;;  %315 = vmatpush.msra.mxu0 %v261_v2  ;;  %v267_v6 = vsel %vm266_vm0, %v728_v5, 0.0  ;;  %v268_v9 = vsel %vm266_vm0, %v732_v7, 0.0  ;;  %v250_v25 = vld [vmem:[%s823_s2 + $0x10] sm:$0xff]  ;;  %v249_v26 = vld [vmem:[%s823_s2 + $0x8] sm:$0xff]  ;;  %v248_v27 = vld [vmem:[%s823_s2] sm:$0xff]  ;;  %s477_s18 = sshll.u32 %s231_s15, 4 }
  0x1b   : > { %277 = vadd.xlane.f32.xlu0 %v267_v6  ;;  %v269_v10 = vadd.f32 %v268_v9, %v267_v6  ;;  %v774_v28 = vld [vmem:[%s243_s11 + $0x8] sm:$0xff]  ;;  %v246_v29 = vld [vmem:[%s243_s11] sm:$0xff]  ;;  %s233_s6 = scalar_lea.vmem [#allocation3], %s477_s18  ;;  %s384_s3 = scalar_lea.sflag [#allocation4], %s231_s15 }
  0x1c   : > { %495 = vmatpush.msra.mxu2 %v260_v3  ;;  %316 = vmatpush.msra.mxu0 %v260_v3  ;;  %v549_v61 = vld [vmem:[%s825_s4] ss:$0 sm:$0xff]  ;;  %s396_s7 = sshll.u32 %s233_s6, 4  ;;  %p580_p3 = pnand %p579_p2, %p575_p13  ;;  %s397_s7 = int_to_ptr.vmem [resolvable:$true] %s396_s7 }
  0x1d   : > { %v270_v12 = vrot.slane %v269_v10, 4  ;;  %v369_v55 = vstv %s265_s12 }
  0x1e   : > { %496 = vmatpush.msra.mxu2 %v259_v4  ;;  %317 = vmatpush.msra.mxu0 %v259_v4 }
  0x1f   : > { %v271_v14 = vadd.f32 %v270_v12, %v269_v10 }
  0x20   : > { %497 = vmatpush.msra.mxu2 %v258_v8  ;;  %318 = vmatpush.msra.mxu0 %v258_v8 }
  0x21   : > { %v272_v16 = vrot.slane %v271_v14, 2 }
  0x22   : > { %498 = vmatpush.msra.mxu2 %v257_v11  ;;  %319 = vmatpush.msra.mxu0 %v257_v11 }
  0x23   : > { %279 = vadd.xlane.f32.xlu0 %v268_v9  ;;  %v273_v18 = vadd.f32 %v272_v16, %v271_v14 }
  0x24   : > { %499 = vmatpush.msra.mxu2 %v256_v13  ;;  %320 = vmatpush.msra.mxu0 %v256_v13 }
  0x25   : > { %v274_v20 = vrot.slane %v273_v18, 1 }
  0x26   : > { %500 = vmatpush.msra.mxu2 %v255_v15  ;;  %321 = vmatpush.msra.mxu0 %v255_v15 }
  0x27   : > { %v275_v22 = vadd.f32 %v274_v20, %v273_v18 }
  0x28   : > { %501 = vmatpush.msra.mxu2 %v254_v17  ;;  %322 = vmatpush.msra.mxu0 %v254_v17 }
  0x29   : > { %v276_v24 = vmax.f32 %v275_v22, 1.0 }
  0x2a   : > { %502 = vmatpush.msra.mxu2 %v253_v19  ;;  %323 = vmatpush.msra.mxu0 %v253_v19 }
  0x2b   : > { %550 = vrsqrt.f32 %v276_v24  ;;  %vm289_vm1 = vweird.f32 %v276_v24 }
  0x2c   : > { %503 = vmatpush.msra.mxu2 %v252_v21  ;;  %324 = vmatpush.msra.mxu0 %v252_v21 }
  0x2e   : > { %504 = vmatpush.msra.mxu2 %v251_v23  ;;  %325 = vmatpush.msra.mxu0 %v251_v23 }
  0x30   : > { %505 = vmatpush.msra.mxu2 %v250_v25  ;;  %326 = vmatpush.msra.mxu0 %v250_v25 }
  0x31   : > { %v551_v30 = vpop.eup %550 }
  0x32   : > { %506 = vmatpush.msra.mxu2 %v249_v26  ;;  %327 = vmatpush.msra.mxu0 %v249_v26  ;;  %v284_v31 = vmul.f32 %v551_v30, %v276_v24  ;;  %vm290_vm2 = vweird.f32 %v551_v30 }
  0x33   : > { %vm291_vm3 = vmor %vm289_vm1, %vm290_vm2 }
  0x34   : > { %507 = vmatpush.msra.mxu2 %v248_v27  ;;  %328 = vmatpush.msra.mxu0 %v248_v27  ;;  %v285_v32 = vmul.f32 %v551_v30, %v284_v31 }
  0x35   : > { %332 = vmatmul.f32.vlgmr.msra.gmra.mxu2 %v774_v28  ;;  %329 = vmatmul.f32.vlgmr.msra.gmra.mxu0 %v246_v29 }
  0x36   : > { %v286_v33 = vmul.f32 0.5, %v285_v32 }
  0x38   : > { %v287_v34 = vsub.f32 1.5, %v286_v33 }
  0x3a   : > { %v288_v35 = vmul.f32 %v551_v30, %v287_v34 }
  0x3c   : > { %v292_v36 = vsel %vm291_vm3, %v551_v30, %v288_v35 }
  0x3d   : > { %v337_v37 = vmul.f32 %v292_v36, %v732_v7  ;;  %v336_v40 = vmul.f32 %v292_v36, %v728_v5 }
  0x8e   : > { %v278_v41 = vpop.xlane.xlu0 %277 }
  0x8f   : > { %v281_v42 = vmax.f32 %v278_v41, 1.0 }
  0x91   : > { %552 = vrsqrt.f32 %v281_v42  ;;  %vm299_vm4 = vweird.f32 %v281_v42 }
  0x96   : > { %v280_v43 = vpop.xlane.xlu0 %279 }
  0x97   : > { %v282_v44 = vmax.f32 %v280_v43, 1.0  ;;  %v553_v45 = vpop.eup %552 }
  0x98   : > { %v294_v46 = vmul.f32 %v553_v45, %v281_v42  ;;  %vm300_vm5 = vweird.f32 %v553_v45 }
  0x99   : > { %554 = vrsqrt.f32 %v282_v44  ;;  %vm301_vm6 = vmor %vm299_vm4, %vm300_vm5  ;;  %vm309_vm7 = vweird.f32 %v282_v44 }
  0x9a   : > { %v295_v47 = vmul.f32 %v553_v45, %v294_v46 }
  0x9c   : > { %v296_v49 = vmul.f32 0.5, %v295_v47 }
  0x9e   : > { %v297_v52 = vsub.f32 1.5, %v296_v49 }
  0x9f   : > { %v555_v48 = vpop.eup %554 }
  0xa0   : > { %v304_v50 = vmul.f32 %v555_v48, %v282_v44  ;;  %v298_v54 = vmul.f32 %v553_v45, %v297_v52  ;;  %vm310_vm8 = vweird.f32 %v555_v48 }
  0xa1   : > { %vm311_vm9 = vmor %vm309_vm7, %vm310_vm8 }
  0xa2   : > { %v305_v51 = vmul.f32 %v555_v48, %v304_v50  ;;  %v302_v57 = vsel %vm301_vm6, %v553_v45, %v298_v54 }
  0xa4   : > { %v306_v53 = vmul.f32 0.5, %v305_v51 }
  0xa6   : > { %v307_v56 = vsub.f32 1.5, %v306_v53 }
  0xa8   : > { %v308_v63 = vmul.f32 %v555_v48, %v307_v56 }
  0xaa   : > { %v312_v2 = vsel %vm311_vm9, %v555_v48, %v308_v63 }
  0xb2   : > { %v330_v39 = vpop.f32.mrf.mxu0 }
  0xb3   : > { %v370_v59 = vmul.f32 %v369_v55, %v330_v39 }
  0xb8   : > { %v333_v38 = vpop.f32.mrf.mxu2 }
  0xb9   : > { %358 = vmatpush.msra.mxu1 %v333_v38  ;;  %v371_v4 = vmul.f32 %v369_v55, %v333_v38 }
  0xbb   : > { %359 = vmatpush.msra.mxu1 %v330_v39 }
  0xbc   : > { %482 = vmatmul.msk.f32.vlgmr.msra.gmra.mxu1 %vm266_vm0, %v336_v40 }
  0xc4   : > { %483 = vmatmul.msk.f32.gmra.mxu1 %vm266_vm0, %v337_v37 }
 0x139   : > { %v361_v58 = vpop.f32.mrf.mxu1 }
 0x13a   : > { %v367_v60 = vmul.f32 %v361_v58, %v302_v57 }
 0x13c   : > { %v372_v62 = vadd.f32 %v370_v59, %v367_v60 }
 0x13e   : > { %v377_v0 = vadd.f32 %v549_v61, %v372_v62 }
 0x140   : > { %v379_v1 = vadd.f32 %v377_v0, %v246_v29 }
 0x141   : > { %v364_v3 = vpop.f32.mrf.mxu1 }
 0x142   : > { %381 = vst [vmem:[%s233_s6] sm:$0xff] %v379_v1  ;;  %v368_v5 = vmul.f32 %v364_v3, %v312_v2 }
 0x144   : > { %v373_v6 = vadd.f32 %v371_v4, %v368_v5 }
 0x146   : > { %v378_v7 = vadd.f32 %v549_v61, %v373_v6 }
 0x148   : > { %v380_v8 = vadd.f32 %v378_v7, %v774_v28 }
 0x14a   : > { %382 = vst [vmem:[%s233_s6 + $0x8] sm:$0xff] %v380_v8 }
 0x14b   : > { %583 = shalt.err (!%p580_p3)
}
 0x14c   : > { %s620_s15 = smov 128   ;;  %s621_s17 = smov 8  }
 0x14d   : > { %508 = dma.vmem_to_hbm [thread:$0]  (%p693_p5), %s397_s7, 256, %s399_s8, %s384_s3, %s620_s15, %s620_s15, %s621_s17  }
 0x14e PF: > { %p514_p4 = scmp.ge.s32.totalorder %s618_s23, 2  ;;  %s413_s18 = sand.u32 1, %s606_s20  }
 0x14f   : > { %s414_s19 = scalar_lea.sflag [#allocation4], %s413_s18 }
 0x150   : > { %p511_p7 = pnand %p514_p4, %p697_p6 }
 0x152   : > { %p512_p8 = pneg %p511_p7 }
 0x154   : > { %601 = dma.done.wait (%p512_p8), %s414_s19, 256  }
 0x155   : > { %603 = vsyncadd (%p512_p8), %s414_s19, 4294967040  ;;  %p16_p9 = scmp.ge.s32.totalorder %s680_s25, 10   ;;  %s829_s20 = smov %s610_s21 }
 0x156   : > { %s830_s21 = smov %s614_s22  ;;  %s831_s22 = smov %s691_s28 }
 0x157   : > { %s832_s23 = smov %s680_s25  ;;  %18 = sbr.rel (!%p16_p9) target bundleno = 5 (0x5), region = 78 }
 0x15c   :  { %420 = vsyncpa [#allocation4], 1 }
 0x15d   :  { %422 = vsyncpa [#allocation4 + $0x1], 1 }

</bundles_post_ra>
